<compile_context>
chip_gen: v5e
topology: v5e:2x2
jax: 0.10.0
libtpu: 0.0.40
codegen_flags: <defaults>
</compile_context>

<pallas_src>
import jax
import jax.numpy as jnp
from jax.experimental import pallas as pl
from jax.experimental.pallas import tpu as pltpu


def _round_up(x, m):
    return ((x + m - 1) // m) * m


def _head_kernel(x_ref, w1_ref, b1_ref, w2_ref, b2_ref, o_ref):
    # x_ref:  [TB, HP]   CLS-token activations (batch tile, padded hidden)
    # w1_ref: [HP, HP]   dense weight, (in, out), VMEM-resident across steps
    # b1_ref: [1,  HP]   dense bias (f32), resident
    # w2_ref: [HP, LP]   out_proj weight, (in, out), resident
    # b2_ref: [1,  LP]   out_proj bias (f32), resident
    # o_ref:  [TB, LP]   logits tile (lane-dense, padded labels)
    x = x_ref[...]

    # dense: MXU matmul with f32 accumulation (x already in weight dtype;
    # astype is a no-op then, but keeps the kernel dtype-agnostic).
    h = jnp.dot(x.astype(w1_ref.dtype), w1_ref[...],
                preferred_element_type=jnp.float32)
    # bias + tanh in f32 (v5e-friendly: no bf16 VPU/EUP there).
    h = jnp.tanh(h + b1_ref[...])

    # out_proj: cast to weight dtype only for the MXU feed.
    out = jnp.dot(h.astype(w2_ref.dtype), w2_ref[...],
                  preferred_element_type=jnp.float32)
    o_ref[...] = (out + b2_ref[...]).astype(o_ref.dtype)


def prepare_params(dense_w, dense_b, out_w, out_b, *, param_dtype=None):
    """One-time parameter prep (call at model init, NOT per forward).

    Transposes (out,in)->(in,out) for lane-major MXU feeds, pads H and L up to
    multiples of 128 (lane-dense), and reshapes biases to 2-D rows.  Padded
    entries are zero, so padded logit columns are exactly 0.
    Use `param_dtype=jnp.bfloat16` in production: native MXU dtype on
    v5e/v6e/v7x, halves weight + activation DMA/VMEM (f32 accumulation keeps
    accuracy).  The f32 default matches the PyTorch reference bit-for-bit-ish.
    """
    H = dense_w.shape[0]
    L = out_w.shape[0]
    HP = _round_up(H, 128)
    LP = _round_up(L, 128)
    wdt = param_dtype if param_dtype is not None else dense_w.dtype

    w1 = jnp.zeros((HP, HP), wdt).at[:H, :H].set(dense_w.T.astype(wdt))
    b1 = jnp.zeros((1, HP), jnp.float32).at[0, :H].set(dense_b.astype(jnp.float32))
    w2 = jnp.zeros((HP, LP), wdt).at[:H, :L].set(out_w.T.astype(wdt))
    b2 = jnp.zeros((1, LP), jnp.float32).at[0, :L].set(out_b.astype(jnp.float32))
    return (w1, b1, w2, b2)


def _choose_batch_tiling(B, tb):
    """Pick (TB, Bp, n_steps) for the 1-D batch grid.

    - n_steps covers B with <= tb rows per step.
    - At least 2 steps when B >= 16 so v7x's 2 TensorCores can split the
      "parallel" axis (no-op on single-TC v5e/v6e).
    - TB rounded to the 8-row sublane granule -> batch padding <= 7 rows
      (never ~2x wasted work at awkward batch sizes).
    """
    n_steps = pl.cdiv(B, tb)
    if B >= 16:
        n_steps = max(n_steps, 2)
    TB = _round_up(pl.cdiv(B, n_steps), 8)
    n_steps = pl.cdiv(B, TB)
    return TB, n_steps * TB, n_steps


def roberta_classification_head(features, params, *, num_labels, tb=1024):
    """features: [B, S, H]; params: output of prepare_params()."""
    w1, b1, w2, b2 = params
    B, S, H = features.shape
    HP = w1.shape[0]
    LP = w2.shape[1]
    compute_dtype = w1.dtype

    TB, Bp, n_steps = _choose_batch_tiling(B, tb)

    # CLS-token slice, cast to the weight/compute dtype (bf16 in production:
    # halves x DMA, native MXU feed), zero-pad to the padded tile shape.
    # allow_input_fusion below lets XLA fuse this producer into the kernel's
    # input read so the [Bp, HP] slab isn't round-tripped through HBM.
    x = features[:, 0, :].astype(compute_dtype)
    if (Bp, HP) != (B, H):
        x = jnp.zeros((Bp, HP), compute_dtype).at[:B, :H].set(x)

    # VMEM budget.  The default pipeline allocates 2 buffers per operand even
    # for the constant-index_map "resident" weights, so count them twice to
    # keep the declared limit honest; cap at 52 MiB (headroom under v7x's
    # 64 MiB physical VMEM for compiler-internal scratch).
    x_isz = jnp.dtype(compute_dtype).itemsize
    w_isz = jnp.dtype(w1.dtype).itemsize
    o_isz = jnp.dtype(features.dtype).itemsize
    needed = (2 * TB * HP * x_isz                 # x tile (double-buffered)
              + 2 * (HP * HP + HP * LP) * w_isz   # w1 + w2 (2 bufs each)
              + 2 * (HP + LP) * 4 * 8             # biases (sublane-padded, 2 bufs)
              + 2 * TB * LP * o_isz)              # out tile (double-buffered)
    vmem_limit = int(min(max(2 * needed, 16 * 1024 * 1024), 52 * 1024 * 1024))

    out = pl.pallas_call(
        _head_kernel,
        out_shape=jax.ShapeDtypeStruct((Bp, LP), features.dtype),
        grid=(n_steps,),
        in_specs=[
            pl.BlockSpec((TB, HP), lambda i: (i, 0)),   # x: batch-tiled
            pl.BlockSpec((HP, HP), lambda i: (0, 0)),   # w1: resident
            pl.BlockSpec((1, HP), lambda i: (0, 0)),    # b1: resident
            pl.BlockSpec((HP, LP), lambda i: (0, 0)),   # w2: resident
            pl.BlockSpec((1, LP), lambda i: (0, 0)),    # b2: resident
        ],
        out_specs=pl.BlockSpec((TB, LP), lambda i: (i, 0)),
        compiler_params=pltpu.CompilerParams(
            dimension_semantics=("parallel",),           # v7x: shard B over 2 TCs
            vmem_limit_bytes=vmem_limit,
            allow_input_fusion=[True, False, False, False, False],
        ),
        cost_estimate=pl.CostEstimate(
            flops=2 * Bp * HP * (HP + LP),
            transcendentals=Bp * HP,
            bytes_accessed=int(Bp * HP * x_isz
                               + (HP * HP + HP * LP) * w_isz
                               + (HP + LP) * 4
                               + Bp * LP * o_isz),
        ),
    )(x, w1, b1, w2, b2)

    # Strip batch / label padding (padded logit columns are exactly 0).
    return out[:B, :num_labels]


def _reference(features, dense_w, dense_b, out_w, out_b):
    x = features[:, 0, :]
    x = jnp.tanh(x @ dense_w.T + dense_b)
    return x @ out_w.T + out_b


if __name__ == "__main__":
    # Small config consistent with the module: hidden_size=32, num_labels=4,
    # batch=2, seq=8.  (Dropout is identity in eval mode.)
    B, S, H, L = 2, 8, 32, 4

    key = jax.random.PRNGKey(0)
    k_feat, k_w1, k_b1, k_w2, k_b2 = jax.random.split(key, 5)

    features = jax.random.normal(k_feat, (B, S, H), dtype=jnp.float32)
    dense_w = jax.random.normal(k_w1, (H, H), dtype=jnp.float32) * 0.05
    dense_b = jax.random.normal(k_b1, (H,), dtype=jnp.float32) * 0.05
    out_w = jax.random.normal(k_w2, (L, H), dtype=jnp.float32) * 0.05
    out_b = jax.random.normal(k_b2, (L,), dtype=jnp.float32) * 0.05

    ref = _reference(features, dense_w, dense_b, out_w, out_b)

    # f32 params: matches the f32 PyTorch reference to tight tolerance.
    params_f32 = prepare_params(dense_w, dense_b, out_w, out_b)
    out_f32 = jax.block_until_ready(
        roberta_classification_head(features, params_f32, num_labels=L))
    assert out_f32.shape == (B, L)
    assert jnp.allclose(out_f32, ref, atol=1e-5, rtol=1e-5), "f32 mismatch vs reference"

    # bf16 params (production path): halved weight/x DMA, f32 accumulation.
    params_bf16 = prepare_params(dense_w, dense_b, out_w, out_b,
                                 param_dtype=jnp.bfloat16)
    out_bf16 = jax.block_until_ready(
        roberta_classification_head(features, params_bf16, num_labels=L))
    assert out_bf16.shape == (B, L)
    assert jnp.allclose(out_bf16, ref, atol=3e-2, rtol=3e-2), "bf16 mismatch vs reference"

    print("KERNEL_OK")
</pallas_src>

<mosaic_0001>
module attributes {stable_mosaic.version = 11 : i64} {
  func.func @_head_kernel(%arg0: i32, %arg1: memref<8x128xf32, #tpu.memory_space<vmem>>, %arg2: memref<128x128xf32, #tpu.memory_space<vmem>>, %arg3: memref<1x128xf32, #tpu.memory_space<vmem>>, %arg4: memref<128x128xf32, #tpu.memory_space<vmem>>, %arg5: memref<1x128xf32, #tpu.memory_space<vmem>>, %arg6: memref<8x128xf32, #tpu.memory_space<vmem>>) attributes {dimension_semantics = [#tpu.dimension_semantics<parallel>], iteration_bounds = array<i64: 1>, scalar_prefetch = 0 : i64, scratch_operands = 0 : i64, tpu.core_type = #tpu.core_type<tc>, window_params = [{transform_indices = @transform_0, window_bounds = array<i64: 8, 128>}, {pipeline_mode = #tpu.pipeline_mode<synchronous>, transform_indices = @transform_1, window_bounds = array<i64: 128, 128>}, {pipeline_mode = #tpu.pipeline_mode<synchronous>, transform_indices = @transform_2, window_bounds = array<i64: 1, 128>}, {pipeline_mode = #tpu.pipeline_mode<synchronous>, transform_indices = @transform_3, window_bounds = array<i64: 128, 128>}, {pipeline_mode = #tpu.pipeline_mode<synchronous>, transform_indices = @transform_4, window_bounds = array<i64: 1, 128>}, {transform_indices = @transform_5, window_bounds = array<i64: 8, 128>}]} {
    %c0 = arith.constant 0 : index
    %c0_0 = arith.constant 0 : index
    %0 = vector.load %arg1[%c0, %c0_0] : memref<8x128xf32, #tpu.memory_space<vmem>>, vector<8x128xf32>
    %c0_1 = arith.constant 0 : index
    %c0_2 = arith.constant 0 : index
    %1 = vector.load %arg2[%c0_1, %c0_2] : memref<128x128xf32, #tpu.memory_space<vmem>>, vector<128x128xf32>
    %cst = arith.constant dense<0.000000e+00> : vector<8x128xf32>
    %2 = tpu.matmul %0, %1, %cst {dimension_numbers = #tpu.dot_dimension_numbers<[1], [0], [0], [1], [0, 0, 1, 1], [], []>} : vector<8x128xf32>, vector<128x128xf32>, vector<8x128xf32> -> vector<8x128xf32>
    %c0_3 = arith.constant 0 : index
    %c0_4 = arith.constant 0 : index
    %3 = vector.load %arg3[%c0_3, %c0_4] : memref<1x128xf32, #tpu.memory_space<vmem>>, vector<1x128xf32>
    %4 = vector.broadcast %3 : vector<1x128xf32> to vector<8x128xf32>
    %5 = arith.addf %2, %4 : vector<8x128xf32>
    %6 = math.tanh %5 : vector<8x128xf32>
    %c0_5 = arith.constant 0 : index
    %c0_6 = arith.constant 0 : index
    %7 = vector.load %arg4[%c0_5, %c0_6] : memref<128x128xf32, #tpu.memory_space<vmem>>, vector<128x128xf32>
    %cst_7 = arith.constant dense<0.000000e+00> : vector<8x128xf32>
    %8 = tpu.matmul %6, %7, %cst_7 {dimension_numbers = #tpu.dot_dimension_numbers<[1], [0], [0], [1], [0, 0, 1, 1], [], []>} : vector<8x128xf32>, vector<128x128xf32>, vector<8x128xf32> -> vector<8x128xf32>
    %c0_8 = arith.constant 0 : index
    %c0_9 = arith.constant 0 : index
    %9 = vector.load %arg5[%c0_8, %c0_9] : memref<1x128xf32, #tpu.memory_space<vmem>>, vector<1x128xf32>
    %10 = vector.broadcast %9 : vector<1x128xf32> to vector<8x128xf32>
    %11 = arith.addf %8, %10 : vector<8x128xf32>
    %c0_10 = arith.constant 0 : index
    %c0_11 = arith.constant 0 : index
    %12 = vector.load %arg6[%c0_10, %c0_11] : memref<8x128xf32, #tpu.memory_space<vmem>>, vector<8x128xf32>
    tpu.vector_store %arg6[%c0_10, %c0_11], %11 {strides = array<i32>} : memref<8x128xf32, #tpu.memory_space<vmem>>, vector<8x128xf32>,
    return
  }
  func.func @transform_0(%arg0: i32) -> (i32, i32) {
    %c0_i32 = arith.constant 0 : i32
    %c0_i32_0 = arith.constant 0 : i32
    return %arg0, %c0_i32 : i32, i32
  }
  func.func @transform_1(%arg0: i32) -> (i32, i32) {
    %c0_i32 = arith.constant 0 : i32
    %c0_i32_0 = arith.constant 0 : i32
    %c0_i32_1 = arith.constant 0 : i32
    return %c0_i32, %c0_i32_0 : i32, i32
  }
  func.func @transform_2(%arg0: i32) -> (i32, i32) {
    %c0_i32 = arith.constant 0 : i32
    %c0_i32_0 = arith.constant 0 : i32
    %c0_i32_1 = arith.constant 0 : i32
    return %c0_i32, %c0_i32_0 : i32, i32
  }
  func.func @transform_3(%arg0: i32) -> (i32, i32) {
    %c0_i32 = arith.constant 0 : i32
    %c0_i32_0 = arith.constant 0 : i32
    %c0_i32_1 = arith.constant 0 : i32
    return %c0_i32, %c0_i32_0 : i32, i32
  }
  func.func @transform_4(%arg0: i32) -> (i32, i32) {
    %c0_i32 = arith.constant 0 : i32
    %c0_i32_0 = arith.constant 0 : i32
    %c0_i32_1 = arith.constant 0 : i32
    return %c0_i32, %c0_i32_0 : i32, i32
  }
  func.func @transform_5(%arg0: i32) -> (i32, i32) {
    %c0_i32 = arith.constant 0 : i32
    %c0_i32_0 = arith.constant 0 : i32
    return %arg0, %c0_i32 : i32, i32
  }
}

</mosaic_0001>

<bundles_post_ra>
// kernel: tpu_custom_call.1
= control target key start
LH: loop header
LB: loop body
LE: loop exit
PB: predicated region body
PF: predicated region fallthrough
CT: control target
= control target key end

     0   :  { %10 = vsyncpa [#allocation3], 0  ;;  %s333_s0 = inlined_call_operand.hbm [shape: f32[8,128], index: 0, kind: input, shape index: {}]   ;;  %s334_s1 = inlined_call_operand.hbm [shape: f32[128,128], index: 1, kind: input, shape index: {}]   ;;  %s335_s2 = inlined_call_operand.vmem [shape: f32[1,128], index: 2, kind: input, shape index: {}]   ;;  %s336_s3 = inlined_call_operand.hbm [shape: f32[128,128], index: 3, kind: input, shape index: {}]   ;;  %s337_s4 = inlined_call_operand.vmem [shape: f32[1,128], index: 4, kind: input, shape index: {}]   ;;  %s338_s5 = inlined_call_operand.hbm [shape: f32[8,128], index: 5, kind: output, shape index: {}]  }
   0x1   :  { %11 = vsyncpa [#allocation6], 0  ;;  %s28_s20 = sshll.u32 %s334_s1, 4  ;;  %s29_s20 = int_to_ptr.hbm [resolvable:$true] %s28_s20 }
   0x2   :  { %12 = vsyncpa [#allocation4], 0  ;;  %s279_s21 = smov [#allocation5]   ;;  %s18_s25 = sshll.u32 %s333_s0, 4  ;;  %s19_s25 = int_to_ptr.hbm [resolvable:$true] %s18_s25 }
   0x3   :  { %s30_s22 = sshll.u32 %s279_s21, 4  ;;  %s280_s26 = smov 128   ;;  %s31_s22 = int_to_ptr.vmem [resolvable:$true] %s30_s22 }
   0x4   :  { %s281_s27 = smov 8   ;;  %s282_s28 = smov [#allocation2]  }
   0x5   :  { %36 = dma.hbm_to_vmem [thread:$0]  %s29_s20, 2048, %s31_s22, [#allocation6], %s280_s26, %s280_s26, %s281_s27  }
   0x6   :  { %s20_s29 = sshll.u32 %s282_s28, 4  ;;  %s43_s7 = sshll.u32 %s336_s3, 4  ;;  %s21_s29 = int_to_ptr.vmem [resolvable:$true] %s20_s29  ;;  %s44_s7 = int_to_ptr.hbm [resolvable:$true] %s43_s7 }
   0x7   :  { %23 = dma.hbm_to_vmem [thread:$0]  %s19_s25, 128, %s21_s29, [#allocation3]  }
   0x8   :  { %s283_s1 = smov [#allocation7]  }
   0x9   :  { %s45_s8 = sshll.u32 %s283_s1, 4  ;;  %s46_s8 = int_to_ptr.vmem [resolvable:$true] %s45_s8 }
   0xa   :  { %51 = dma.hbm_to_vmem [thread:$0]  %s44_s7, 2048, %s46_s8, [#allocation6], %s280_s26, %s280_s26, %s281_s27  }
   0xb   :  { %273 = dma.done.wait [#allocation3], 128  }
   0xc   :  { %274 = vsyncadd [#allocation3], 4294967168 }
   0xd   :  { %275 = dma.done.wait [#allocation6], 4096  }
   0xe   :  { %276 = vsyncadd [#allocation6], 4294963200  ;;  %v82_v0 = vld [vmem:[#allocation5 + $0x78] sm:$0xff]  ;;  %v81_v1 = vld [vmem:[#allocation5 + $0x70] sm:$0xff]  ;;  %s284_s11 = smov [#allocation8]   ;;  %s156_s15 = sshll.u32 %s338_s5, 4  ;;  %s157_s15 = int_to_ptr.hbm [resolvable:$true] %s156_s15 }
   0xf   :  { %87 = vmatpush.msra.mxu0 %v82_v0  ;;  %v80_v2 = vld [vmem:[#allocation5 + $0x68] sm:$0xff]  ;;  %v79_v3 = vld [vmem:[#allocation5 + $0x60] sm:$0xff]  ;;  %v123_v4 = vld [vmem:[#allocation7 + $0x78] sm:$0xff]  ;;  %s154_s12 = sshll.u32 %s284_s11, 4  ;;  %s155_s12 = int_to_ptr.vmem [resolvable:$true] %s154_s12 }
  0x10   :  { %v78_v5 = vld [vmem:[#allocation5 + $0x58] sm:$0xff]  ;;  %128 = vmatpush.msra.mxu1 %v123_v4  ;;  %v122_v6 = vld [vmem:[#allocation7 + $0x70] sm:$0xff]  ;;  %v121_v7 = vld [vmem:[#allocation7 + $0x68] sm:$0xff] }
  0x11   :  { %88 = vmatpush.msra.mxu0 %v81_v1  ;;  %v77_v8 = vld [vmem:[#allocation5 + $0x50] sm:$0xff]  ;;  %v120_v9 = vld [vmem:[#allocation7 + $0x60] sm:$0xff]  ;;  %v76_v10 = vld [vmem:[#allocation5 + $0x48] sm:$0xff] }
  0x12   :  { %129 = vmatpush.msra.mxu1 %v122_v6  ;;  %v119_v11 = vld [vmem:[#allocation7 + $0x58] sm:$0xff]  ;;  %v75_v12 = vld [vmem:[#allocation5 + $0x40] sm:$0xff]  ;;  %v118_v13 = vld [vmem:[#allocation7 + $0x50] sm:$0xff] }
  0x13   :  { %89 = vmatpush.msra.mxu0 %v80_v2  ;;  %v74_v14 = vld [vmem:[#allocation5 + $0x38] sm:$0xff]  ;;  %v117_v15 = vld [vmem:[#allocation7 + $0x48] sm:$0xff]  ;;  %v73_v16 = vld [vmem:[#allocation5 + $0x30] sm:$0xff] }
  0x14   :  { %130 = vmatpush.msra.mxu1 %v121_v7  ;;  %v116_v17 = vld [vmem:[#allocation7 + $0x40] sm:$0xff]  ;;  %v72_v18 = vld [vmem:[#allocation5 + $0x28] sm:$0xff]  ;;  %v115_v19 = vld [vmem:[#allocation7 + $0x38] sm:$0xff] }
  0x15   :  { %90 = vmatpush.msra.mxu0 %v79_v3  ;;  %v71_v20 = vld [vmem:[#allocation5 + $0x20] sm:$0xff]  ;;  %v114_v21 = vld [vmem:[#allocation7 + $0x30] sm:$0xff]  ;;  %v70_v22 = vld [vmem:[#allocation5 + $0x18] sm:$0xff] }
  0x16   :  { %131 = vmatpush.msra.mxu1 %v120_v9  ;;  %v113_v23 = vld [vmem:[#allocation7 + $0x28] sm:$0xff]  ;;  %v69_v24 = vld [vmem:[#allocation5 + $0x10] sm:$0xff]  ;;  %v67_v26 = vld [vmem:[#allocation5] sm:$0xff] }
  0x17   :  { %91 = vmatpush.msra.mxu0 %v78_v5  ;;  %v68_v25 = vld [vmem:[#allocation5 + $0x8] sm:$0xff]  ;;  %v66_v27 = vld [vmem:[#allocation2] sm:$0xff]  ;;  %v112_v28 = vld [vmem:[#allocation7 + $0x20] sm:$0xff] }
  0x18   :  { %132 = vmatpush.msra.mxu1 %v119_v11  ;;  %v111_v29 = vld [vmem:[#allocation7 + $0x18] sm:$0xff]  ;;  %v110_v30 = vld [vmem:[#allocation7 + $0x10] sm:$0xff]  ;;  %v109_v31 = vld [vmem:[#allocation7 + $0x8] sm:$0xff] }
  0x19   :  { %92 = vmatpush.msra.mxu0 %v77_v8  ;;  %v108_v32 = vld [vmem:[#allocation7] sm:$0xff]  ;;  %v173_v33 = vld [vmem:[%s335_s2] ss:$0 sm:$0xff] }
  0x1a   :  { %133 = vmatpush.msra.mxu1 %v118_v13  ;;  %v174_v37 = vld [vmem:[%s337_s4] ss:$0 sm:$0xff] }
  0x1b   :  { %93 = vmatpush.msra.mxu0 %v76_v10 }
  0x1c   :  { %134 = vmatpush.msra.mxu1 %v117_v15 }
  0x1d   :  { %94 = vmatpush.msra.mxu0 %v75_v12 }
  0x1e   :  { %135 = vmatpush.msra.mxu1 %v116_v17 }
  0x1f   :  { %95 = vmatpush.msra.mxu0 %v74_v14 }
  0x20   :  { %136 = vmatpush.msra.mxu1 %v115_v19 }
  0x21   :  { %96 = vmatpush.msra.mxu0 %v73_v16 }
  0x22   :  { %137 = vmatpush.msra.mxu1 %v114_v21 }
  0x23   :  { %97 = vmatpush.msra.mxu0 %v72_v18 }
  0x24   :  { %138 = vmatpush.msra.mxu1 %v113_v23 }
  0x25   :  { %98 = vmatpush.msra.mxu0 %v71_v20 }
  0x26   :  { %139 = vmatpush.msra.mxu1 %v112_v28 }
  0x27   :  { %99 = vmatpush.msra.mxu0 %v70_v22 }
  0x28   :  { %140 = vmatpush.msra.mxu1 %v111_v29 }
  0x29   :  { %100 = vmatpush.msra.mxu0 %v69_v24 }
  0x2a   :  { %141 = vmatpush.msra.mxu1 %v110_v30 }
  0x2b   :  { %101 = vmatpush.msra.mxu0 %v68_v25 }
  0x2c   :  { %142 = vmatpush.msra.mxu1 %v109_v31 }
  0x2d   :  { %102 = vmatpush.msra.mxu0 %v67_v26 }
  0x2e   :  { %103 = vmatmul.f32.vlgmr.msra.gmra.mxu0 %v66_v27  ;;  %143 = vmatpush.msra.mxu1 %v108_v32 }
  0xab   :  { %v104_v34 = vpop.f32.mrf.mxu0 }
  0xac   :  { %v105_v35 = vadd.f32 %v173_v33, %v104_v34 }
  0xae   :  { %175 = vtanh.f32 %v105_v35 }
  0xb4   :  { %v176_v36 = vpop.eup %175 }
  0xb5   :  { %144 = vmatmul.f32.vlgmr.msra.gmra.mxu1 %v176_v36 }
 0x132   :  { %v145_v38 = vpop.f32.mrf.mxu1 }
 0x133   :  { %v146_v39 = vadd.f32 %v174_v37, %v145_v38 }
 0x135   :  { %148 = vst [vmem:[#allocation8] sm:$0xff] %v146_v39 }
 0x136   :  { %159 = dma.vmem_to_hbm [thread:$0]  %s155_s12, 128, %s157_s15, [#allocation4]  }
 0x137   :  { %277 = dma.done.wait [#allocation4], 128  }
 0x138   :  { %278 = vsyncadd [#allocation4], 4294967168 }
 0x139   :  { %164 = vsyncpa [#allocation3], 1 }
 0x13a   :  { %165 = vsyncpa [#allocation6], 1 }
 0x13b   :  { %166 = vsyncpa [#allocation4], 1 }

</bundles_post_ra>
